<compile_context>
chip_gen: v7x
topology: tpu7x:2x2x1
jax: 0.10.0
libtpu: 0.0.40
codegen_flags: <defaults>
</compile_context>

<pallas_src>
import jax
import jax.numpy as jnp
from jax import lax
from jax.experimental import pallas as pl
from jax.experimental.pallas import tpu as pltpu

DROP_P = 0.1
SCALE = 1.0 / (64.0 ** 0.5)  # the torch module hardcodes .div(64 ** 0.5)


def mha_kernel(q_ref, k_ref, v_ref, u_ref, o_ref):
    """Single-invocation multi-head SDPA.

    q_ref, k_ref: (H, N, Dk)   v_ref: (H, N, Dv)   u_ref: (H, N, N) uniform[0,1)
    o_ref: (N, H*Dv) lane-dense output; head h occupies columns [h*Dv, (h+1)*Dv).
    """
    H, _, Dv = v_ref.shape
    inv_keep = 1.0 / (1.0 - DROP_P)

    outs = []
    for h in range(H):  # static unroll; H is tiny
        # Fold the scale into q: N*Dk multiplies instead of N*N on the scores.
        q = q_ref[h] * SCALE            # (N, Dk), native dtype
        k = k_ref[h]                    # (N, Dk)
        v = v_ref[h]                    # (N, Dv)

        # QK^T without materializing a transposed K: contract last dims of both.
        s = lax.dot_general(
            q, k,
            dimension_numbers=(((1,), (1,)), ((), ())),
            preferred_element_type=jnp.float32,
        )                               # (N, N) f32

        # Softmax numerator / denominator; normalization is deferred to the output.
        m = jnp.max(s, axis=-1, keepdims=True)
        e = jnp.exp(s - m)                          # (N, N) f32
        denom = jnp.sum(e, axis=-1, keepdims=True)  # (N, 1)  f32

        # Dropout on the UNnormalized probabilities (commutes with the per-row
        # 1/denom scale).  Uniforms are precomputed outside the kernel so no
        # TPU-only PRNG primitive is needed.
        p = jnp.where(u_ref[h] >= DROP_P, e * inv_keep, 0.0)

        # attn @ V in the input dtype (full-rate MXU), f32 accumulation.
        o = jnp.dot(p.astype(v.dtype), v, preferred_element_type=jnp.float32)

        # Deferred softmax normalization on the (N, Dv) output, not the (N, N) matrix.
        # TODO(synk): switch to pl.reciprocal(denom, approx=True) (EUP slot) when the
        # CPU interpret fallback is no longer needed.
        outs.append(o * (1.0 / denom))

    # One unmasked full-lane (N, H*Dv) store instead of per-head 64-lane stores.
    o_ref[...] = jnp.concatenate(outs, axis=-1).astype(o_ref.dtype)


def fused_attention(q, k, v, dropout_key, batch_size, seq_len, num_head):
    """q, k: (B*S, H, Dk); v: (B*S, H, Dv).  Returns (B, S, H, Dv) like the torch module."""
    N, H, Dk = q.shape
    Dv = v.shape[-1]
    assert N == batch_size * seq_len and H == num_head

    # torch: permute(1, 0, 2) -> (H, N, D)
    qh = jnp.transpose(q, (1, 0, 2))
    kh = jnp.transpose(k, (1, 0, 2))
    vh = jnp.transpose(v, (1, 0, 2))

    # TODO(synk): torch's dropout RNG stream cannot be reproduced bit-exactly; the
    # keep probability (1 - 0.1) and the 1/(1-p) rescale match exactly.
    u = jax.random.uniform(dropout_key, (H, N, N), dtype=jnp.float32)

    out = pl.pallas_call(
        mha_kernel,
        out_shape=jax.ShapeDtypeStruct((N, H * Dv), q.dtype),
        grid_spec=pl.GridSpec(
            grid=(1,),
            in_specs=[
                pl.BlockSpec((H, N, Dk), lambda i: (0, 0, 0)),
                pl.BlockSpec((H, N, Dk), lambda i: (0, 0, 0)),
                pl.BlockSpec((H, N, Dv), lambda i: (0, 0, 0)),
                pl.BlockSpec((H, N, N), lambda i: (0, 0, 0)),
            ],
            out_specs=pl.BlockSpec((N, H * Dv), lambda i: (0, 0)),
        ),
        compiler_params=pltpu.CompilerParams(
            dimension_semantics=("arbitrary",),
        ),
    )(qh, kh, vh, u)                                   # (N, H*Dv), lane-dense

    # (N, H*Dv) -> (N, H, Dv): exactly torch's output.transpose(1, 0) of (H, N, Dv),
    # obtained for free from the lane-dense layout.
    out = out.reshape(N, H, Dv)
    # Replicate the torch tail exactly (row-major reshape then permute):
    out = out.reshape(num_head, batch_size, seq_len, -1)   # reshape(H, B, S, -1)
    out = jnp.transpose(out, (1, 2, 0, 3))                 # permute(1, 2, 0, 3)
    return out


def reference_attention(q, k, v, u, batch_size, seq_len, num_head):
    """Pure-JAX mirror of the torch module, using the same dropout uniforms."""
    qh = jnp.transpose(q, (1, 0, 2))
    kh = jnp.transpose(k, (1, 0, 2))
    vh = jnp.transpose(v, (1, 0, 2))
    s = jnp.einsum("hqd,hkd->hqk", qh, kh) / (64.0 ** 0.5)
    p = jax.nn.softmax(s, axis=-1)
    p = jnp.where(u >= DROP_P, p / (1.0 - DROP_P), 0.0)
    o = jnp.einsum("hqk,hkd->hqd", p, vh)
    o = jnp.transpose(o, (1, 0, 2))
    o = o.reshape(num_head, batch_size, seq_len, -1)
    return jnp.transpose(o, (1, 2, 0, 3))


if __name__ == "__main__":
    # Small shapes consistent with the module: B=2, S=8, H=2, Dk=32, Dv=64 (N=16).
    B, S, H, DK, DV = 2, 8, 2, 32, 64
    key = jax.random.PRNGKey(0)
    kq, kk, kv, kd = jax.random.split(key, 4)
    q = jax.random.normal(kq, (B * S, H, DK), dtype=jnp.float32)
    k = jax.random.normal(kk, (B * S, H, DK), dtype=jnp.float32)
    v = jax.random.normal(kv, (B * S, H, DV), dtype=jnp.float32)

    out = fused_attention(q, k, v, kd, B, S, H)
    out = jax.block_until_ready(out)
    assert out.shape == (B, S, H, DV), out.shape

    # Correctness check against a pure-JAX reference using the identical dropout mask.
    u = jax.random.uniform(kd, (H, B * S, B * S), dtype=jnp.float32)
    ref = reference_attention(q, k, v, u, B, S, H)
    max_err = float(jnp.max(jnp.abs(out - ref)))
    assert jnp.allclose(out, ref, atol=1e-4, rtol=1e-4), max_err

    print("KERNEL_OK")
</pallas_src>

<mosaic_0001>
module attributes {stable_mosaic.version = 11 : i64} {
  func.func @mha_kernel(%arg0: i32, %arg1: memref<2x16x32xf32, #tpu.memory_space<vmem>>, %arg2: memref<2x16x32xf32, #tpu.memory_space<vmem>>, %arg3: memref<2x16x64xf32, #tpu.memory_space<vmem>>, %arg4: memref<2x16x16xf32, #tpu.memory_space<vmem>>, %arg5: memref<16x128xf32, #tpu.memory_space<vmem>>) attributes {dimension_semantics = [#tpu.dimension_semantics<arbitrary>], iteration_bounds = array<i64: 1>, scalar_prefetch = 0 : i64, scratch_operands = 0 : i64, tpu.core_type = #tpu.core_type<tc>, window_params = [{pipeline_mode = #tpu.pipeline_mode<synchronous>, transform_indices = @transform_0, window_bounds = array<i64: 2, 16, 32>}, {pipeline_mode = #tpu.pipeline_mode<synchronous>, transform_indices = @transform_1, window_bounds = array<i64: 2, 16, 32>}, {pipeline_mode = #tpu.pipeline_mode<synchronous>, transform_indices = @transform_2, window_bounds = array<i64: 2, 16, 64>}, {pipeline_mode = #tpu.pipeline_mode<synchronous>, transform_indices = @transform_3, window_bounds = array<i64: 2, 16, 16>}, {pipeline_mode = #tpu.pipeline_mode<synchronous>, transform_indices = @transform_4, window_bounds = array<i64: 16, 128>}]} {
    %c0 = arith.constant 0 : index
    %c0_0 = arith.constant 0 : index
    %c0_1 = arith.constant 0 : index
    %0 = vector.load %arg1[%c0, %c0_0, %c0_1] : memref<2x16x32xf32, #tpu.memory_space<vmem>>, vector<1x16x32xf32>
    %1 = vector.shape_cast %0 : vector<1x16x32xf32> to vector<16x32xf32>
    %cst = arith.constant 1.250000e-01 : f32
    %2 = vector.broadcast %cst : f32 to vector<16x32xf32>
    %3 = arith.mulf %1, %2 : vector<16x32xf32>
    %c0_2 = arith.constant 0 : index
    %c0_3 = arith.constant 0 : index
    %c0_4 = arith.constant 0 : index
    %4 = vector.load %arg2[%c0_2, %c0_3, %c0_4] : memref<2x16x32xf32, #tpu.memory_space<vmem>>, vector<1x16x32xf32>
    %5 = vector.shape_cast %4 : vector<1x16x32xf32> to vector<16x32xf32>
    %c0_5 = arith.constant 0 : index
    %c0_6 = arith.constant 0 : index
    %c0_7 = arith.constant 0 : index
    %6 = vector.load %arg3[%c0_5, %c0_6, %c0_7] : memref<2x16x64xf32, #tpu.memory_space<vmem>>, vector<1x16x64xf32>
    %7 = vector.shape_cast %6 : vector<1x16x64xf32> to vector<16x64xf32>
    %cst_8 = arith.constant dense<0.000000e+00> : vector<16x16xf32>
    %8 = tpu.matmul %3, %5, %cst_8 {dimension_numbers = #tpu.dot_dimension_numbers<[1], [1], [0], [0], [0, 0, 1, 0], [], []>} : vector<16x32xf32>, vector<16x32xf32>, vector<16x16xf32> -> vector<16x16xf32>
    %cst_9 = arith.constant dense<0xFF800000> : vector<16xf32>
    %9 = vector.multi_reduction <maximumf>, %8, %cst_9 [1] : vector<16x16xf32> to vector<16xf32>
    %10 = vector.shape_cast %9 : vector<16xf32> to vector<16x1xf32>
    %11 = vector.broadcast %10 : vector<16x1xf32> to vector<16x16xf32>
    %12 = arith.subf %8, %11 : vector<16x16xf32>
    %13 = math.exp %12 : vector<16x16xf32>
    %cst_10 = arith.constant dense<0.000000e+00> : vector<16xf32>
    %14 = vector.multi_reduction <add>, %13, %cst_10 [1] : vector<16x16xf32> to vector<16xf32>
    %15 = vector.shape_cast %14 : vector<16xf32> to vector<16x1xf32>
    %c0_11 = arith.constant 0 : index
    %c0_12 = arith.constant 0 : index
    %c0_13 = arith.constant 0 : index
    %16 = vector.load %arg4[%c0_11, %c0_12, %c0_13] : memref<2x16x16xf32, #tpu.memory_space<vmem>>, vector<1x16x16xf32>
    %17 = vector.shape_cast %16 : vector<1x16x16xf32> to vector<16x16xf32>
    %cst_14 = arith.constant 1.000000e-01 : f32
    %18 = vector.broadcast %cst_14 : f32 to vector<16x16xf32>
    %19 = arith.cmpf oge, %17, %18 : vector<16x16xf32>
    %cst_15 = arith.constant 1.11111116 : f32
    %20 = vector.broadcast %cst_15 : f32 to vector<16x16xf32>
    %21 = arith.mulf %13, %20 : vector<16x16xf32>
    %cst_16 = arith.constant 0.000000e+00 : f32
    %22 = vector.broadcast %cst_16 : f32 to vector<16x16xf32>
    %23 = arith.select %19, %21, %22 : vector<16x16xi1>, vector<16x16xf32>
    %cst_17 = arith.constant dense<0.000000e+00> : vector<16x64xf32>
    %24 = tpu.matmul %23, %7, %cst_17 {dimension_numbers = #tpu.dot_dimension_numbers<[1], [0], [0], [1], [0, 0, 1, 1], [], []>} : vector<16x16xf32>, vector<16x64xf32>, vector<16x64xf32> -> vector<16x64xf32>
    %cst_18 = arith.constant 1.000000e+00 : f32
    %25 = vector.broadcast %cst_18 : f32 to vector<16x1xf32>
    %26 = arith.divf %25, %15 : vector<16x1xf32>
    %27 = vector.broadcast %26 : vector<16x1xf32> to vector<16x64xf32>
    %28 = arith.mulf %24, %27 : vector<16x64xf32>
    %c1 = arith.constant 1 : index
    %c0_19 = arith.constant 0 : index
    %c0_20 = arith.constant 0 : index
    %29 = vector.load %arg1[%c1, %c0_19, %c0_20] : memref<2x16x32xf32, #tpu.memory_space<vmem>>, vector<1x16x32xf32>
    %30 = vector.shape_cast %29 : vector<1x16x32xf32> to vector<16x32xf32>
    %cst_21 = arith.constant 1.250000e-01 : f32
    %31 = vector.broadcast %cst_21 : f32 to vector<16x32xf32>
    %32 = arith.mulf %30, %31 : vector<16x32xf32>
    %c1_22 = arith.constant 1 : index
    %c0_23 = arith.constant 0 : index
    %c0_24 = arith.constant 0 : index
    %33 = vector.load %arg2[%c1_22, %c0_23, %c0_24] : memref<2x16x32xf32, #tpu.memory_space<vmem>>, vector<1x16x32xf32>
    %34 = vector.shape_cast %33 : vector<1x16x32xf32> to vector<16x32xf32>
    %c1_25 = arith.constant 1 : index
    %c0_26 = arith.constant 0 : index
    %c0_27 = arith.constant 0 : index
    %35 = vector.load %arg3[%c1_25, %c0_26, %c0_27] : memref<2x16x64xf32, #tpu.memory_space<vmem>>, vector<1x16x64xf32>
    %36 = vector.shape_cast %35 : vector<1x16x64xf32> to vector<16x64xf32>
    %cst_28 = arith.constant dense<0.000000e+00> : vector<16x16xf32>
    %37 = tpu.matmul %32, %34, %cst_28 {dimension_numbers = #tpu.dot_dimension_numbers<[1], [1], [0], [0], [0, 0, 1, 0], [], []>} : vector<16x32xf32>, vector<16x32xf32>, vector<16x16xf32> -> vector<16x16xf32>
    %cst_29 = arith.constant dense<0xFF800000> : vector<16xf32>
    %38 = vector.multi_reduction <maximumf>, %37, %cst_29 [1] : vector<16x16xf32> to vector<16xf32>
    %39 = vector.shape_cast %38 : vector<16xf32> to vector<16x1xf32>
    %40 = vector.broadcast %39 : vector<16x1xf32> to vector<16x16xf32>
    %41 = arith.subf %37, %40 : vector<16x16xf32>
    %42 = math.exp %41 : vector<16x16xf32>
    %cst_30 = arith.constant dense<0.000000e+00> : vector<16xf32>
    %43 = vector.multi_reduction <add>, %42, %cst_30 [1] : vector<16x16xf32> to vector<16xf32>
    %44 = vector.shape_cast %43 : vector<16xf32> to vector<16x1xf32>
    %c1_31 = arith.constant 1 : index
    %c0_32 = arith.constant 0 : index
    %c0_33 = arith.constant 0 : index
    %45 = vector.load %arg4[%c1_31, %c0_32, %c0_33] : memref<2x16x16xf32, #tpu.memory_space<vmem>>, vector<1x16x16xf32>
    %46 = vector.shape_cast %45 : vector<1x16x16xf32> to vector<16x16xf32>
    %cst_34 = arith.constant 1.000000e-01 : f32
    %47 = vector.broadcast %cst_34 : f32 to vector<16x16xf32>
    %48 = arith.cmpf oge, %46, %47 : vector<16x16xf32>
    %cst_35 = arith.constant 1.11111116 : f32
    %49 = vector.broadcast %cst_35 : f32 to vector<16x16xf32>
    %50 = arith.mulf %42, %49 : vector<16x16xf32>
    %cst_36 = arith.constant 0.000000e+00 : f32
    %51 = vector.broadcast %cst_36 : f32 to vector<16x16xf32>
    %52 = arith.select %48, %50, %51 : vector<16x16xi1>, vector<16x16xf32>
    %cst_37 = arith.constant dense<0.000000e+00> : vector<16x64xf32>
    %53 = tpu.matmul %52, %36, %cst_37 {dimension_numbers = #tpu.dot_dimension_numbers<[1], [0], [0], [1], [0, 0, 1, 1], [], []>} : vector<16x16xf32>, vector<16x64xf32>, vector<16x64xf32> -> vector<16x64xf32>
    %cst_38 = arith.constant 1.000000e+00 : f32
    %54 = vector.broadcast %cst_38 : f32 to vector<16x1xf32>
    %55 = arith.divf %54, %44 : vector<16x1xf32>
    %56 = vector.broadcast %55 : vector<16x1xf32> to vector<16x64xf32>
    %57 = arith.mulf %53, %56 : vector<16x64xf32>
    %58 = tpu.concatenate %28, %57 in 1 : vector<16x64xf32>, vector<16x64xf32> -> vector<16x128xf32>
    %c0_39 = arith.constant 0 : index
    %c0_40 = arith.constant 0 : index
    %59 = vector.load %arg5[%c0_39, %c0_40] : memref<16x128xf32, #tpu.memory_space<vmem>>, vector<16x128xf32>
    tpu.vector_store %arg5[%c0_39, %c0_40], %58 {strides = array<i32>} : memref<16x128xf32, #tpu.memory_space<vmem>>, vector<16x128xf32>,
    return
  }
  func.func @transform_0(%arg0: i32) -> (i32, i32, i32) {
    %c0_i32 = arith.constant 0 : i32
    %c0_i32_0 = arith.constant 0 : i32
    %c0_i32_1 = arith.constant 0 : i32
    %c0_i32_2 = arith.constant 0 : i32
    return %c0_i32, %c0_i32_0, %c0_i32_1 : i32, i32, i32
  }
  func.func @transform_1(%arg0: i32) -> (i32, i32, i32) {
    %c0_i32 = arith.constant 0 : i32
    %c0_i32_0 = arith.constant 0 : i32
    %c0_i32_1 = arith.constant 0 : i32
    %c0_i32_2 = arith.constant 0 : i32
    return %c0_i32, %c0_i32_0, %c0_i32_1 : i32, i32, i32
  }
  func.func @transform_2(%arg0: i32) -> (i32, i32, i32) {
    %c0_i32 = arith.constant 0 : i32
    %c0_i32_0 = arith.constant 0 : i32
    %c0_i32_1 = arith.constant 0 : i32
    %c0_i32_2 = arith.constant 0 : i32
    return %c0_i32, %c0_i32_0, %c0_i32_1 : i32, i32, i32
  }
  func.func @transform_3(%arg0: i32) -> (i32, i32, i32) {
    %c0_i32 = arith.constant 0 : i32
    %c0_i32_0 = arith.constant 0 : i32
    %c0_i32_1 = arith.constant 0 : i32
    %c0_i32_2 = arith.constant 0 : i32
    return %c0_i32, %c0_i32_0, %c0_i32_1 : i32, i32, i32
  }
  func.func @transform_4(%arg0: i32) -> (i32, i32) {
    %c0_i32 = arith.constant 0 : i32
    %c0_i32_0 = arith.constant 0 : i32
    %c0_i32_1 = arith.constant 0 : i32
    return %c0_i32, %c0_i32_0 : i32, i32
  }
}

</mosaic_0001>

<bundles_post_ra>
// kernel: tpu_custom_call.1
= control target key start
LH: loop header
LB: loop body
LE: loop exit
PB: predicated region body
PF: predicated region fallthrough
CT: control target
= control target key end

     0   :  { %9 = vsyncpa [#allocation3], 0  ;;  %s903_s0 = inlined_call_operand.hbm [shape: f32[2,16,32], index: 0, kind: input, shape index: {}]   ;;  %s904_s1 = inlined_call_operand.hbm [shape: f32[2,16,32], index: 1, kind: input, shape index: {}]   ;;  %s905_s2 = inlined_call_operand.hbm [shape: f32[2,16,64], index: 2, kind: input, shape index: {}]   ;;  %s906_s3 = inlined_call_operand.hbm [shape: f32[2,16,16], index: 3, kind: input, shape index: {}]   ;;  %s907_s4 = inlined_call_operand.hbm [shape: f32[16,128], index: 4, kind: output, shape index: {}]  }
   0x1   :  { %10 = vsyncpa [#allocation6], 0 }
   0x2   :  { %11 = vsyncpa [#allocation9], 0 }
   0x3   :  { %12 = vsyncpa [#allocation4], 0  ;;  %s745_s15 = smov [#allocation5]   ;;  %s746_s17 = smov [#allocation2]  }
   0x4   :  { %s30_s16 = sshll.u32 %s745_s15, 4  ;;  %s18_s18 = sshll.u32 %s746_s17, 4  ;;  %s31_s16 = int_to_ptr.vmem [resolvable:$true] %s30_s16  ;;  %s778_s18 = int_to_ptr.vmem [resolvable:$true] %s18_s18 }
   0x5   :  { %s627_s21 = scalar_lea.hbm %s904_s1, 512 }
   0x6   :  { %p628_p0 = scmp.ne.s32.totalorder %s904_s1, %s627_s21  ;;  %p631_p1 = scmp.lt.u32.totalorder %s627_s21, %s904_s1 }
   0x8   :  { %p633_p2 = pnand %p631_p1, %p628_p0 }
   0xa   :  { %636 = shalt.err (!%p633_p2)
}
   0xb   :  { %s637_s26 = scalar_lea.vmem %s31_s16, 512  ;;  %p642_p4 = scmp.lt.s32.totalorder %s31_s16, %s31_s16 }
   0xc   :  { %p638_p3 = scmp.ne.s32.totalorder %s31_s16, %s637_s26  ;;  %p643_p5 = scmp.lt.s32.totalorder %s637_s26, %s637_s26 }
   0xe   :  { %p644_p6 = por %p643_p5, %p642_p4 }
  0x10   :  { %p645_p7 = pnand %p644_p6, %p638_p3 }
  0x12   :  { %648 = shalt.err (!%p645_p7)
}
  0x13   :  { %s747_s27 = smov 128   ;;  %s748_s28 = smov 8  }
  0x14   :  { %36 = dma.hbm_to_vmem [thread:$0]  %s904_s1, 512, %s31_s16, [#allocation6], %s747_s27, %s747_s27, %s748_s28  }
  0x15   :  { %s649_s7 = scalar_lea.hbm %s903_s0, 512 }
  0x16   :  { %p650_p8 = scmp.ne.s32.totalorder %s903_s0, %s649_s7  ;;  %p653_p9 = scmp.lt.u32.totalorder %s649_s7, %s903_s0 }
  0x18   :  { %p655_p10 = pnand %p653_p9, %p650_p8 }
  0x1a   :  { %658 = shalt.err (!%p655_p10)
}
  0x1b   :  { %s659_s12 = scalar_lea.vmem %s778_s18, 512  ;;  %p664_p12 = scmp.lt.s32.totalorder %s778_s18, %s778_s18 }
  0x1c   :  { %p660_p11 = scmp.ne.s32.totalorder %s778_s18, %s659_s12  ;;  %p665_p13 = scmp.lt.s32.totalorder %s659_s12, %s659_s12 }
  0x1e   :  { %p666_p0 = por %p665_p13, %p664_p12 }
  0x20   :  { %p667_p1 = pnand %p666_p0, %p660_p11 }
  0x22   :  { %670 = shalt.err (!%p667_p1)
}
  0x23   :  { %24 = dma.hbm_to_vmem [thread:$0]  %s903_s0, 512, %s778_s18, [#allocation3], %s747_s27, %s747_s27, %s748_s28  }
  0x24   :  { %s749_s14 = smov [#allocation7]   ;;  %s750_s16 = smov [#allocation8]  }
  0x25   :  { %s42_s15 = sshll.u32 %s749_s14, 4  ;;  %s54_s17 = sshll.u32 %s750_s16, 4  ;;  %s43_s15 = int_to_ptr.vmem [resolvable:$true] %s42_s15  ;;  %s815_s17 = int_to_ptr.vmem [resolvable:$true] %s54_s17 }
  0x26   :  { %s671_s21 = scalar_lea.hbm %s905_s2, 512 }
  0x27   :  { %p672_p2 = scmp.ne.s32.totalorder %s905_s2, %s671_s21  ;;  %p675_p3 = scmp.lt.u32.totalorder %s671_s21, %s905_s2 }
  0x29   :  { %p677_p4 = pnand %p675_p3, %p672_p2 }
  0x2b   :  { %680 = shalt.err (!%p677_p4)
}
  0x2c   :  { %s681_s0 = scalar_lea.vmem %s43_s15, 512  ;;  %p686_p6 = scmp.lt.s32.totalorder %s43_s15, %s43_s15 }
  0x2d   :  { %p682_p5 = scmp.ne.s32.totalorder %s43_s15, %s681_s0  ;;  %p687_p7 = scmp.lt.s32.totalorder %s681_s0, %s681_s0 }
  0x2f   :  { %p688_p8 = por %p687_p7, %p686_p6 }
  0x31   :  { %p689_p9 = pnand %p688_p8, %p682_p5 }
  0x33   :  { %692 = shalt.err (!%p689_p9)
}
  0x34   :  { %48 = dma.hbm_to_vmem [thread:$0]  %s905_s2, 512, %s43_s15, [#allocation6], %s747_s27, %s747_s27, %s748_s28  }
  0x35   :  { %s693_s5 = scalar_lea.hbm %s906_s3, 512 }
  0x36   :  { %p694_p10 = scmp.ne.s32.totalorder %s906_s3, %s693_s5  ;;  %p697_p11 = scmp.lt.u32.totalorder %s693_s5, %s906_s3 }
  0x38   :  { %p699_p12 = pnand %p697_p11, %p694_p10 }
  0x3a   :  { %702 = shalt.err (!%p699_p12)
}
  0x3b   :  { %s703_s10 = scalar_lea.vmem %s815_s17, 512  ;;  %p708_p0 = scmp.lt.s32.totalorder %s815_s17, %s815_s17 }
  0x3c   :  { %p704_p13 = scmp.ne.s32.totalorder %s815_s17, %s703_s10  ;;  %p709_p1 = scmp.lt.s32.totalorder %s703_s10, %s703_s10 }
  0x3e   :  { %p710_p2 = por %p709_p1, %p708_p0 }
  0x40   :  { %p711_p3 = pnand %p710_p2, %p704_p13 }
  0x42   :  { %714 = shalt.err (!%p711_p3)
}
  0x43   :  { %60 = dma.hbm_to_vmem [thread:$0]  %s906_s3, 512, %s815_s17, [#allocation9], %s747_s27, %s747_s27, %s748_s28  }
  0x44   :  { %737 = dma.done.wait [#allocation3], 512  }
  0x45   :  { %738 = vsyncadd [#allocation3], 4294966784 }
  0x46   :  { %739 = dma.done.wait [#allocation6], 1024  }
  0x47   :  { %740 = vsyncadd [#allocation6], 4294966272 }
  0x48   :  { %741 = dma.done.wait [#allocation9], 512  }
  0x49   :  { %742 = vsyncadd [#allocation9], 4294966784  ;;  %vm81_vm0 = vcmask 261120   ;;  %v77_v1 = vld [vmem:[#allocation5] sm:$0xff]  ;;  %v78_v2 = vld [vmem:[#allocation5 + $0x8] sm:$0xff]  ;;  %vm169_vm2 = vcmask 130048  }
  0x4a   :  { %vm854_vm1 = vmpackc.low %vm81_vm0, %vm81_vm0  ;;  %v73_v3 = vld [vmem:[#allocation2] sm:$0xff]  ;;  %v583_v4 = vpack.c.bf16 %v78_v2, %v77_v1  ;;  %v74_v6 = vld [vmem:[#allocation2 + $0x8] sm:$0xff]  ;;  %s751_s3 = smov 64   ;;  %vm503_vm7 = vcmask 523264   ;;  %s752_s12 = smov [#allocation10]  }
  0x4b   :  { %v75_v5 = vmul.f32 0.125, %v73_v3  ;;  %v76_v7 = vmul.f32 0.125, %v74_v6  ;;  %v79_v12 = vld [vmem:[#allocation7] sm:$0xff]  ;;  %v80_v13 = vld [vmem:[#allocation7 + $0x8] sm:$0xff]  ;;  %v289_v15 = vld [vmem:[#allocation5 + $0x10] sm:$0xff]  ;;  %s513_s1 = sshll.u32 %s752_s12, 4  ;;  %s514_s1 = int_to_ptr.vmem [resolvable:$true] %s513_s1 }
  0x4c   :  { %585 = vmatprep.subr.msk.bf16.mxu0 %vm854_vm1, %v583_v4  ;;  %v589_v14 = vpack.c.bf16 %v80_v13, %v79_v12  ;;  %v290_v16 = vld [vmem:[#allocation5 + $0x18] sm:$0xff]  ;;  %v188_v24 = vld [vmem:[#allocation8] sm:$0xff]  ;;  %v189_v27 = vld [vmem:[#allocation8 + $0x8] sm:$0xff]  ;;  %s715_s13 = scalar_lea.vmem %s514_s1, 256  ;;  %p720_p5 = scmp.lt.s32.totalorder %s514_s1, %s514_s1 }
  0x4d   :  { %559 = vmatprep.mubr.msk.f32.mxu0 %vm81_vm0, %v75_v5  ;;  %588 = vmatpush3.bf16.xpose.msk.msra.mxu0 %vm854_vm1, %v583_v4  ;;  %v593_v17 = vpack.c.bf16 %v290_v16, %v289_v15  ;;  %vm190_vm3 = vcmp.ge.f32.partialorder %v188_v24, 0.1  ;;  %v284_v28 = vld [vmem:[#allocation2 + $0x10] sm:$0xff]  ;;  %vm191_vm4 = vcmp.ge.f32.partialorder %v189_v27, 0.1  ;;  %v285_v34 = vld [vmem:[#allocation2 + $0x18] sm:$0xff]  ;;  %p716_p4 = scmp.ne.s32.totalorder %s514_s1, %s715_s13  ;;  %p721_p6 = scmp.lt.s32.totalorder %s715_s13, %s715_s13 }
  0x4e   :  { %590 = vmatprep.subr.bf16.mxu1 %v589_v14  ;;  %v286_v32 = vmul.f32 0.125, %v284_v28  ;;  %v287_v35 = vmul.f32 0.125, %v285_v34  ;;  %v292_v42 = vld [vmem:[#allocation7 + $0x10] sm:$0xff]  ;;  %v293_v43 = vld [vmem:[#allocation7 + $0x18] sm:$0xff] }
  0x4f   :  { %592 = vmatpush3.bf16.msra.mxu1 %v589_v14  ;;  %v599_v44 = vpack.c.bf16 %v293_v43, %v292_v42  ;;  %v400_v51 = vld [vmem:[#allocation8 + $0x10] sm:$0xff]  ;;  %v401_v55 = vld [vmem:[#allocation8 + $0x18] sm:$0xff]  ;;  %p722_p7 = por %p721_p6, %p720_p5 }
  0x50   :  { %595 = vmatprep.subr.msk.bf16.mxu1 %vm854_vm1, %v593_v17  ;;  %vm402_vm5 = vcmp.ge.f32.partialorder %v400_v51, 0.1  ;;  %vm403_vm6 = vcmp.ge.f32.partialorder %v401_v55, 0.1 }
  0x51   :  { %600 = vmatprep.subr.bf16.mxu0 %v599_v44  ;;  %p723_p8 = pnand %p722_p7, %p716_p4 }
  0x54   :  { %560 = vmatmul.mubr.msk.f32.vlgmr.msra.gmra.mrb[0].mxu0 %vm81_vm0, %v76_v7 }
  0x55   :  { %602 = vmatpush3.bf16.msra.mxu0 %v599_v44 }
 0x127   :  { %v561_v8 = vpop.f32.mrb[0].mxu0 }
 0x128   :  { %v160_v9 = vpop.f32.mrb[1].mxu0  ;;  %v173_v11 = vsel %vm169_vm2, %v561_v8, -inf }
 0x129   :  { %v170_v10 = vsel %vm169_vm2, %v160_v9, -inf }
 0x12a   :  { %171 = vmax.xlane.f32.xlu0 %v170_v10 }
 0x12e   :  { %174 = vmax.xlane.f32.xlu0 %v173_v11 }
 0x1b7   :  { %v172_v18 = vpop.xlane.xlu0 %171 }
 0x1b8   :  { %v176_v19 = vsub.f32 %v160_v9, %v172_v18 }
 0x1ba   :  { %v178_v20 = vmul.f32 1.442695, %v176_v19 }
 0x1bb   :  { %v175_v21 = vpop.xlane.xlu0 %174 }
 0x1bc   :  { %611 = vpow2.f32 %v178_v20  ;;  %v177_v22 = vsub.f32 %v561_v8, %v175_v21 }
 0x1be   :  { %v180_v23 = vmul.f32 1.442695, %v177_v22 }
 0x1c0   :  { %613 = vpow2.f32 %v180_v23 }
 0x1c6   :  { %v612_v25 = vpop.eup %611 }
 0x1c7   :  { %v192_v26 = vmul.f32 1.1111112, %v612_v25  ;;  %v182_v58 = vsel %vm169_vm2, %v612_v25, 0.0 }
 0x1c9   :  { %v194_v29 = vsel %vm190_vm3, %v192_v26, 0.0 }
 0x1ca   :  { %v614_v30 = vpop.eup %613  ;;  %566 = vmatprep.mubr.msk.f32.mxu1 %vm169_vm2, %v194_v29 }
 0x1cb   :  { %v193_v31 = vmul.f32 1.1111112, %v614_v30  ;;  %v185_v62 = vsel %vm169_vm2, %v614_v30, 0.0 }
 0x1cd   :  { %v195_v33 = vsel %vm191_vm4, %v193_v31, 0.0 }
 0x1ce   :  { %567 = vmatmul.mubr.msk.f32.vlgmr.msra.gmra.mrb[0].mxu1 %vm169_vm2, %v195_v33 }
 0x1cf   :  { %598 = vmatpush3.bf16.xpose.msk.msra.mxu1 %vm854_vm1, %v593_v17  ;;  %573 = vmatprep.mubr.msk.f32.mxu1 %vm81_vm0, %v286_v32 }
 0x1d6   :  { %574 = vmatmul.mubr.msk.f32.vlgmr.msra.gmra.mrb[2].mxu1 %vm81_vm0, %v287_v35 }
 0x2a1   :  { %v874_v36 = vpop.f32.mrb[0].mxu1 }
 0x2a2   :  { %v876_v37 = vpop.f32.mrb[1].mxu1 }
 0x2a9   :  { %v575_v38 = vpop.f32.mrb[2].mxu1 }
 0x2aa   :  { %v372_v39 = vpop.f32.mrb[3].mxu1  ;;  %v384_v41 = vsel %vm169_vm2, %v575_v38, -inf }
 0x2ab   :  { %v381_v40 = vsel %vm169_vm2, %v372_v39, -inf }
 0x2ac   :  { %382 = vmax.xlane.f32.xlu1 %v381_v40 }
 0x2b0   :  { %385 = vmax.xlane.f32.xlu1 %v384_v41 }
 0x339   :  { %v383_v45 = vpop.xlane.xlu1 %382 }
 0x33a   :  { %v387_v46 = vsub.f32 %v372_v39, %v383_v45 }
 0x33c   :  { %v389_v47 = vmul.f32 1.442695, %v387_v46 }
 0x33d   :  { %v386_v48 = vpop.xlane.xlu1 %385 }
 0x33e   :  { %615 = vpow2.f32 %v389_v47  ;;  %v388_v49 = vsub.f32 %v575_v38, %v386_v48 }
 0x340   :  { %v391_v50 = vmul.f32 1.442695, %v388_v49 }
 0x342   :  { %617 = vpow2.f32 %v391_v50 }
 0x348   :  { %v616_v52 = vpop.eup %615 }
 0x349   :  { %v393_v53 = vsel %vm169_vm2, %v616_v52, 0.0  ;;  %v404_v54 = vmul.f32 1.1111112, %v616_v52 }
 0x34a   :  { %394 = vadd.xlane.f32.xlu0 %v393_v53 }
 0x34b   :  { %v406_v56 = vsel %vm402_vm5, %v404_v54, 0.0 }
 0x34c   :  { %v618_v57 = vpop.eup %617  ;;  %580 = vmatprep.mubr.msk.f32.mxu0 %vm169_vm2, %v406_v56 }
 0x34d   :  { %v396_v59 = vsel %vm169_vm2, %v618_v57, 0.0  ;;  %v405_v60 = vmul.f32 1.1111112, %v618_v57 }
 0x34e   :  { %183 = vadd.xlane.f32.xlu0 %v182_v58  ;;  %397 = vadd.xlane.f32.xlu1 %v396_v59 }
 0x34f   :  { %v407_v61 = vsel %vm403_vm6, %v405_v60, 0.0 }
 0x350   :  { %581 = vmatmul.mubr.msk.f32.vlgmr.msra.gmra.mrb[2].mxu0 %vm169_vm2, %v407_v61 }
 0x352   :  { %186 = vadd.xlane.f32.xlu1 %v185_v62 }
 0x3d7   :  { %v395_v0 = vpop.xlane.xlu0 %394 }
 0x3db   :  { %v398_v63 = vpop.xlane.xlu1 %397  ;;  %v184_v8 = vpop.xlane.xlu0 %183 }
 0x3dc   :  { %619 = vrcp.f32 %v398_v63 }
 0x3dd   :  { %621 = vrcp.f32 %v395_v0 }
 0x3df   :  { %v187_v7 = vpop.xlane.xlu1 %186 }
 0x3e0   :  { %623 = vrcp.f32 %v187_v7 }
 0x3e1   :  { %625 = vrcp.f32 %v184_v8 }
 0x3e6   :  { %v620_v1 = vpop.eup %619 }
 0x3e7   :  { %v622_v3 = vpop.eup %621 }
 0x3ea   :  { %v624_v9 = vpop.eup %623 }
 0x3eb   :  { %v626_v10 = vpop.eup %625  ;;  %v282_v11 = vmul.f32 %v624_v9, %v874_v36 }
 0x3ec   :  { %v281_v13 = vmul.f32 %v626_v10, %v876_v37 }
 0x423   :  { %v582_v2 = vpop.f32.mrb[2].mxu0 }
 0x424   :  { %v494_v4 = vmul.f32 %v620_v1, %v582_v2  ;;  %v480_v5 = vpop.f32.mrb[3].mxu0 }
 0x425   :  { %v493_v6 = vmul.f32 %v622_v3, %v480_v5 }
 0x426   :  { %499 = vrot.lane.b32.xlu1 %v494_v4, %s751_s3 }
 0x427   :  { %497 = vrot.lane.b32.xlu0 %v493_v6, %s751_s3 }
 0x498   :  { %v500_v12 = vpop.permute.xlu1 %499 }
 0x499   :  { %v505_v14 = vsel %vm503_vm7, %v282_v11, %v500_v12  ;;  %v498_v15 = vpop.permute.xlu0 %497 }
 0x49a   :  { %507 = vst [vmem:[#allocation10 + $0x8] sm:$0xff] %v505_v14  ;;  %v504_v16 = vsel %vm503_vm7, %v281_v13, %v498_v15 }
 0x49b   :  { %506 = vst [vmem:[#allocation10] sm:$0xff] %v504_v16 }
 0x49c   :  { %726 = shalt.err (!%p723_p8)
}
 0x49d   :  { %s727_s16 = scalar_lea.hbm %s907_s4, 256 }
 0x49e   :  { %p728_p9 = scmp.ne.s32.totalorder %s907_s4, %s727_s16  ;;  %p731_p10 = scmp.lt.u32.totalorder %s727_s16, %s907_s4 }
 0x4a0   :  { %p733_p11 = pnand %p731_p10, %p728_p9 }
 0x4a2   :  { %736 = shalt.err (!%p733_p11)
}
 0x4a3   :  { %519 = dma.vmem_to_hbm [thread:$0]  %s514_s1, 256, %s907_s4, [#allocation4], %s747_s27, %s747_s27, %s748_s28  }
 0x4a4   :  { %743 = dma.done.wait [#allocation4], 256  }
 0x4a5   :  { %744 = vsyncadd [#allocation4], 4294967040 }
 0x4a6   :  { %523 = vsyncpa [#allocation3], 1 }
 0x4a7   :  { %524 = vsyncpa [#allocation6], 1 }
 0x4a8   :  { %525 = vsyncpa [#allocation9], 1 }
 0x4a9   :  { %526 = vsyncpa [#allocation4], 1 }

</bundles_post_ra>
